<compile_context>
chip_gen: v7x
topology: tpu7x:2x2x1
jax: 0.10.0
libtpu: 0.0.40
codegen_flags: <defaults>
</compile_context>

<pallas_src>
import numpy as np
import jax
import jax.numpy as jnp
from jax import lax
from jax.experimental import pallas as pl
from jax.experimental.pallas import tpu as pltpu

EPS = 1e-5
SLAB_ALIGN = 16   # bf16 packs 2 rows/sublane -> (16,128) tiles; DMA starts/sizes align to 16
WIN_ALIGN = 8     # per-cluster windows slice an f32 VMEM scratch -> 8-sublane alignment


def _round_up(x, m):
    return ((x + m - 1) // m) * m


def _is_v7x():
    try:
        return "v7" in jax.devices()[0].device_kind.lower()
    except Exception:
        return False


# ----------------------------------------------------------------------------
# Kernel 1: row-tiled matmul (bf16 MXU, f32 accum) + BN partial statistics.
# Stats are emitted per row tile (no accumulator -> axis stays "parallel");
# the tiny (nt, 2*C) reduction is finished in XLA.  Zero-padded rows
# contribute exactly 0 to sum / sumsq (no bias), so statistics stay correct
# when dividing by the real N.
# ----------------------------------------------------------------------------
def _matmul_stats_kernel(x_ref, w_ref, y_ref, stats_ref):
    y = jnp.dot(x_ref[...], w_ref[...], preferred_element_type=jnp.float32)
    # bf16 store: halves the HBM traffic of the (N, Cout) intermediate.
    y_ref[...] = y.astype(y_ref.dtype)
    # stats from the f32 accumulator, *before* the downcast
    s1 = jnp.sum(y, axis=0, keepdims=True)        # (1, C)
    s2 = jnp.sum(y * y, axis=0, keepdims=True)    # (1, C)
    stats_ref[...] = jnp.concatenate([s1, s2], axis=1)   # (1, 2C) lane-dense


def matmul_with_stats(x_bf16, w_bf16, *, row_tile):
    n_rows, c_in = x_bf16.shape
    c_out = w_bf16.shape[1]
    assert n_rows % row_tile == 0 and row_tile % 16 == 0
    nt = n_rows // row_tile
    y, stats = pl.pallas_call(
        _matmul_stats_kernel,
        out_shape=(
            jax.ShapeDtypeStruct((n_rows, c_out), jnp.bfloat16),
            jax.ShapeDtypeStruct((nt, 2 * c_out), jnp.float32),
        ),
        grid=(nt,),
        in_specs=[
            pl.BlockSpec((row_tile, c_in), lambda i: (i, 0)),
            pl.BlockSpec((c_in, c_out), lambda i: (0, 0)),
        ],
        out_specs=(
            pl.BlockSpec((row_tile, c_out), lambda i: (i, 0)),
            pl.BlockSpec((1, 2 * c_out), lambda i: (i, 0)),
        ),
        compiler_params=pltpu.CompilerParams(
            dimension_semantics=("parallel",)),
    )(x_bf16, w_bf16)
    return y, stats


# ----------------------------------------------------------------------------
# Kernel 2: fused BN-affine + ReLU + segment-max over cluster tiles.
#   grid = (n_outer "parallel", n_inner "arbitrary"); each step handles
#   `cluster_tile` consecutive clusters.  Sorted bf16 features live in HBM;
#   the contiguous row range of the tile is DMA'd (16-row aligned, fixed size
#   row_cap) into a buffer_depth-slot VMEM scratch.  Scalar SMEM reads are
#   hoisted above the wait; the next tile's DMA starts before the wait.
#   One bf16->f32 cast + affine + ReLU per slab; per cluster only a bounded
#   cluster_cap-row window of the slab is masked and max-reduced.
# ----------------------------------------------------------------------------
def segment_max_pool(y_sorted_bf16, scale, shift, idx_ptr_pad, *,
                     cluster_tile, cluster_cap, row_cap,
                     n_outer, n_inner, buffer_depth):
    n_rows_pad, c = y_sorted_bf16.shape
    tc = cluster_tile
    db = buffer_depth
    m_pad = n_outer * n_inner * tc

    def kernel(idx_ptr_ref, scale_ref, shift_ref, feat_hbm,
               out_ref, buf, act_ref, sem):
        o = pl.program_id(0)
        i = pl.program_id(1)
        t = o * n_inner + i                # global cluster-tile index
        slot = i % db

        # ---- hoist ALL SMEM scalar reads above any DMA wait ----
        ptr = [idx_ptr_ref[t * tc + k] for k in range(tc + 1)]
        base = pl.multiple_of((ptr[0] // SLAB_ALIGN) * SLAB_ALIGN, SLAB_ALIGN)
        nxt_i = jnp.minimum((t + db - 1) * tc, m_pad)   # clamp padded tail
        nxt = pl.multiple_of(
            (idx_ptr_ref[nxt_i] // SLAB_ALIGN) * SLAB_ALIGN, SLAB_ALIGN)

        def start_copy(start_row, slot_):
            pltpu.make_async_copy(
                feat_hbm.at[pl.ds(start_row, row_cap)],
                buf.at[slot_], sem.at[slot_]).start()

        @pl.when(i == 0)
        def _():                           # prime this outer chunk (db-1 deep)
            for j in range(db - 1):
                if j < n_inner:
                    sj = idx_ptr_ref[(t + j) * tc]
                    sj = pl.multiple_of((sj // SLAB_ALIGN) * SLAB_ALIGN,
                                        SLAB_ALIGN)
                    start_copy(sj, j)

        @pl.when(i + db - 1 < n_inner)     # prefetch tile t+db-1 BEFORE the wait
        def _():
            start_copy(nxt, (i + db - 1) % db)

        # wait for the current tile's slab (descriptor matches what was started)
        pltpu.make_async_copy(feat_hbm.at[pl.ds(base, row_cap)],
                              buf.at[slot], sem.at[slot]).wait()

        # one bf16->f32 cast + BN affine + ReLU per slab
        act_ref[...] = jnp.maximum(
            buf[slot].astype(jnp.float32) * scale_ref[...] + shift_ref[...],
            0.0)

        # bounded per-cluster windows instead of full-slab scans
        rid0 = lax.broadcasted_iota(jnp.int32, (cluster_cap, 1), 0)
        rows = []
        for k in range(tc):                # static unroll; tc small
            s = ptr[k] - base
            e = ptr[k + 1] - base
            # aligned window start; the clamp only ever hits empty pad clusters
            w0 = jnp.minimum((s // WIN_ALIGN) * WIN_ALIGN,
                             row_cap - cluster_cap)
            w0 = pl.multiple_of(w0, WIN_ALIGN)
            win = act_ref[pl.ds(w0, cluster_cap), :]
            rid = rid0 + w0
            m = (rid >= s) & (rid < e)
            # 0.0 fill is exact: values are post-ReLU (>= 0); padded clusters -> 0
            rows.append(jnp.max(jnp.where(m, win, 0.0), axis=0, keepdims=True))
        out_ref[...] = jnp.concatenate(rows, axis=0)    # (tc, C) dense store

    grid_spec = pltpu.PrefetchScalarGridSpec(
        num_scalar_prefetch=1,
        grid=(n_outer, n_inner),
        in_specs=[
            pl.BlockSpec((1, c), lambda o, i, ptr: (0, 0)),   # BN scale
            pl.BlockSpec((1, c), lambda o, i, ptr: (0, 0)),   # BN shift
            pl.BlockSpec(memory_space=pl.ANY),                # sorted feats, HBM
        ],
        out_specs=pl.BlockSpec((tc, c), lambda o, i, ptr: (o * n_inner + i, 0)),
        scratch_shapes=[
            pltpu.VMEM((db, row_cap, c), jnp.bfloat16),   # DMA slabs
            pltpu.VMEM((row_cap, c), jnp.float32),        # post-affine activations
            pltpu.SemaphoreType.DMA((db,)),
        ],
    )
    return pl.pallas_call(
        kernel,
        grid_spec=grid_spec,
        out_shape=jax.ShapeDtypeStruct((m_pad, c), jnp.float32),
        compiler_params=pltpu.CompilerParams(
            dimension_semantics=("parallel", "arbitrary")),
    )(idx_ptr_pad, scale, shift, y_sorted_bf16)


# ----------------------------------------------------------------------------
# GridPool forward (host glue in numpy, dense compute in the kernels above)
# ----------------------------------------------------------------------------
def offset2batch(offset):
    counts = np.diff(np.concatenate([[0], np.asarray(offset)]))
    return np.repeat(np.arange(len(counts)), counts).astype(np.int64)


def batch2offset(batch):
    return np.cumsum(np.bincount(batch)).astype(np.int64)


def grid_pool_forward(data_dict, params, grid_size, *,
                      row_tile=1024, cluster_tile=32):
    coord_np = np.asarray(data_dict["coord"], dtype=np.float32)   # (N, 3)
    offset = np.asarray(data_dict["offset"])
    feat_dev = jnp.asarray(data_dict["feat"], dtype=jnp.float32)  # stays on device
    batch = offset2batch(offset)
    B = int(batch.max()) + 1
    N = coord_np.shape[0]
    Cout = int(params["w"].shape[0])

    # ---- host glue on concrete values (mirrors voxel_grid / torch.unique) ----
    start = np.stack([coord_np[batch == b].min(axis=0) for b in range(B)])
    v = np.floor((coord_np - start[batch]) / grid_size).astype(np.int64)
    dims = v.max(axis=0) + 1
    key = ((batch * dims[2] + v[:, 2]) * dims[1] + v[:, 1]) * dims[0] + v[:, 0]
    unique, cluster, counts = np.unique(key, return_inverse=True,
                                        return_counts=True)
    sorted_idx = np.argsort(cluster, kind="stable").astype(np.int32)
    idx_ptr = np.concatenate([[0], np.cumsum(counts)]).astype(np.int32)
    M = int(unique.shape[0])

    # ---- cluster-tile / slab geometry for kernel 2 ----
    is_v7 = _is_v7x()
    Tc = cluster_tile
    n_tiles = -(-M // Tc)
    n_outer = 2 if (is_v7 and n_tiles >= 2) else 1   # megacore only where it exists
    n_inner = -(-n_tiles // n_outer)
    n_tiles_pad = n_outer * n_inner
    M_pad = n_tiles_pad * Tc
    buffer_depth = 3 if is_v7 else 2                 # deeper pipeline vs shared-HBM latency
    idx_ptr_pad = np.full((M_pad + 1,), N, dtype=np.int32)
    idx_ptr_pad[:M + 1] = idx_ptr
    tile_rows = np.diff(idx_ptr_pad[::Tc])
    max_cluster = int(counts.max())
    cluster_cap = _round_up(max_cluster + WIN_ALIGN, WIN_ALIGN)
    # slab covers the tile's rows + DMA-start alignment slack + window slack
    row_cap = _round_up(int(tile_rows.max()) + SLAB_ALIGN + cluster_cap,
                        SLAB_ALIGN)
    # TODO(synk): heavily skewed cluster sizes inflate cluster_cap/row_cap;
    # cap + split fat clusters if that ever matters for real data.

    # ---- kernel-1 geometry: big row tiles (HBM-bound pass) ----
    rt = max(16, min(int(row_tile), _round_up(N + row_cap, 256)))
    n_rows_pad = _round_up(N + row_cap, rt)

    # ---- device-side gather to cluster-sorted order + bf16 cast + zero pad.
    #      fc (no bias) and the batch statistics are permutation invariant, so
    #      kernel 1 writes its output already sorted -> no (N, Cout) gather. ----
    x_sorted = jnp.take(feat_dev, jnp.asarray(sorted_idx), axis=0).astype(jnp.bfloat16)
    x_sorted = jnp.pad(x_sorted, ((0, n_rows_pad - N), (0, 0)))
    w_t_bf16 = jnp.asarray(params["w"], jnp.float32).T.astype(jnp.bfloat16)

    # ---- kernel 1: tiled matmul + BN partial stats (bf16 output) ----
    y_sorted, stats = matmul_with_stats(x_sorted, w_t_bf16, row_tile=rt)

    # ---- tiny per-channel BN finalisation (training-mode batch stats) ----
    # TODO(synk): E[y^2]-E[y]^2 can cancel for large activation means; an
    # X^T X (Cin x Cin) stats path would avoid it (and the intermediate).
    gamma = jnp.asarray(params["gamma"], jnp.float32).reshape(-1)
    beta = jnp.asarray(params["beta"], jnp.float32).reshape(-1)
    n_real = np.float32(N)
    mean = jnp.sum(stats[:, :Cout], axis=0) / n_real
    var = jnp.maximum(jnp.sum(stats[:, Cout:], axis=0) / n_real - mean * mean,
                      0.0)
    inv_std = lax.rsqrt(var + EPS)
    scale = (gamma * inv_std).reshape(1, Cout)
    shift = (beta - mean * gamma * inv_std).reshape(1, Cout)

    # ---- kernel 2: fused BN + ReLU + segment max over clusters ----
    feat_out = segment_max_pool(
        y_sorted, scale, shift, jnp.asarray(idx_ptr_pad),
        cluster_tile=Tc, cluster_cap=cluster_cap, row_cap=row_cap,
        n_outer=n_outer, n_inner=n_inner, buffer_depth=buffer_depth)[:M]

    # ---- coord mean per cluster: tiny (N,3) path -> XLA segment_sum ----
    coord_sum = jax.ops.segment_sum(jnp.asarray(coord_np),
                                    jnp.asarray(cluster.astype(np.int32)),
                                    num_segments=M)
    coord_out = coord_sum / jnp.asarray(counts, jnp.float32)[:, None]

    new_batch = batch[idx_ptr[:-1]]
    new_offset = batch2offset(new_batch)

    return {
        "coord": coord_out,
        "feat": feat_out,
        "offset": new_offset,
        "cluster": cluster.astype(np.int64),
    }


# ----------------------------------------------------------------------------
# Demo / correctness check
# ----------------------------------------------------------------------------
if __name__ == "__main__":
    key = jax.random.PRNGKey(0)
    k1, k2, k3, k4, k5 = jax.random.split(key, 5)

    # small shapes: B=2 batches of 40 + 24 points, Cin=16, Cout=128 (lane-dense)
    N1, N2 = 40, 24
    N = N1 + N2
    Cin, Cout = 16, 128
    grid_size = 0.25

    coord = jax.random.uniform(k1, (N, 3), dtype=jnp.float32)
    feat = jax.random.normal(k2, (N, Cin), dtype=jnp.float32)
    offset = np.array([N1, N], dtype=np.int64)

    w = (jax.random.normal(k3, (Cout, Cin), dtype=jnp.float32)
         / np.sqrt(Cin)).astype(jnp.float32)
    gamma = jax.random.uniform(k4, (Cout,), jnp.float32, 0.5, 1.5)
    beta = 0.1 * jax.random.normal(k5, (Cout,), jnp.float32)
    params = {"w": w, "gamma": gamma, "beta": beta}

    out = grid_pool_forward({"coord": coord, "feat": feat, "offset": offset},
                            params, grid_size)
    jax.block_until_ready(out["feat"])
    jax.block_until_ready(out["coord"])

    # ---------- numpy reference (same bf16 roundings as the kernels) ----------
    coord_r = np.asarray(coord)
    feat_bf = np.asarray(jnp.asarray(feat, jnp.bfloat16).astype(jnp.float32))
    w_bf = np.asarray(jnp.asarray(w, jnp.bfloat16).astype(jnp.float32))
    gamma_r = np.asarray(gamma)
    beta_r = np.asarray(beta)
    batch_r = offset2batch(offset)

    y = feat_bf @ w_bf.T
    mean = y.mean(axis=0, keepdims=True)
    var = y.var(axis=0, keepdims=True)                 # biased, like BN training
    scale_r = gamma_r / np.sqrt(var + EPS)
    shift_r = beta_r - mean * scale_r
    y_q = np.asarray(jnp.asarray(y, jnp.bfloat16).astype(jnp.float32))  # bf16 storage
    y_act = np.maximum(y_q * scale_r + shift_r, 0.0)

    start_r = np.stack([coord_r[batch_r == b].min(axis=0) for b in range(2)])
    v_r = np.floor((coord_r - start_r[batch_r]) / grid_size).astype(np.int64)
    dims_r = v_r.max(axis=0) + 1
    key_r = ((batch_r * dims_r[2] + v_r[:, 2]) * dims_r[1]
             + v_r[:, 1]) * dims_r[0] + v_r[:, 0]
    uniq, inv, cnts = np.unique(key_r, return_inverse=True, return_counts=True)
    M = len(uniq)
    coord_ref = np.stack([coord_r[inv == m].mean(axis=0) for m in range(M)])
    feat_ref = np.stack([y_act[inv == m].max(axis=0) for m in range(M)])
    ptr_ref = np.concatenate([[0], np.cumsum(cnts)])
    offset_ref = np.cumsum(np.bincount(batch_r[ptr_ref[:-1]]))

    np.testing.assert_allclose(np.asarray(out["coord"]), coord_ref,
                               rtol=1e-4, atol=1e-4)
    np.testing.assert_allclose(np.asarray(out["feat"]), feat_ref,
                               rtol=2e-2, atol=2e-2)
    assert np.array_equal(np.asarray(out["cluster"]), inv)
    assert np.array_equal(np.asarray(out["offset"]), offset_ref)
    assert out["feat"].shape == (M, Cout)
    assert out["coord"].shape == (M, 3)

    print("KERNEL_OK")
</pallas_src>

<mosaic_0001>
module attributes {stable_mosaic.version = 11 : i64} {
  func.func @_matmul_stats_kernel(%arg0: i32, %arg1: memref<256x16xbf16, #tpu.memory_space<vmem>>, %arg2: memref<16x128xbf16, #tpu.memory_space<vmem>>, %arg3: memref<256x128xbf16, #tpu.memory_space<vmem>>, %arg4: memref<1x256xf32, #tpu.memory_space<vmem>>) attributes {dimension_semantics = [#tpu.dimension_semantics<parallel>], iteration_bounds = array<i64: 1>, scalar_prefetch = 0 : i64, scratch_operands = 0 : i64, tpu.core_type = #tpu.core_type<tc>, window_params = [{transform_indices = @transform_0, window_bounds = array<i64: 256, 16>}, {pipeline_mode = #tpu.pipeline_mode<synchronous>, transform_indices = @transform_1, window_bounds = array<i64: 16, 128>}, {transform_indices = @transform_2, window_bounds = array<i64: 256, 128>}, {transform_indices = @transform_3, window_bounds = array<i64: 1, 256>}]} {
    %c0 = arith.constant 0 : index
    %c0_0 = arith.constant 0 : index
    %0 = vector.load %arg1[%c0, %c0_0] : memref<256x16xbf16, #tpu.memory_space<vmem>>, vector<256x16xbf16>
    %c0_1 = arith.constant 0 : index
    %c0_2 = arith.constant 0 : index
    %1 = vector.load %arg2[%c0_1, %c0_2] : memref<16x128xbf16, #tpu.memory_space<vmem>>, vector<16x128xbf16>
    %cst = arith.constant dense<0.000000e+00> : vector<256x128xf32>
    %2 = tpu.matmul %0, %1, %cst {dimension_numbers = #tpu.dot_dimension_numbers<[1], [0], [0], [1], [0, 0, 1, 1], [], []>} : vector<256x16xbf16>, vector<16x128xbf16>, vector<256x128xf32> -> vector<256x128xf32>
    %3 = arith.truncf %2 : vector<256x128xf32> to vector<256x128xbf16>
    %c0_3 = arith.constant 0 : index
    %c0_4 = arith.constant 0 : index
    %4 = vector.load %arg3[%c0_3, %c0_4] : memref<256x128xbf16, #tpu.memory_space<vmem>>, vector<256x128xbf16>
    tpu.vector_store %arg3[%c0_3, %c0_4], %3 {strides = array<i32>} : memref<256x128xbf16, #tpu.memory_space<vmem>>, vector<256x128xbf16>,
    %cst_5 = arith.constant dense<0.000000e+00> : vector<128xf32>
    %5 = vector.multi_reduction <add>, %2, %cst_5 [0] : vector<256x128xf32> to vector<128xf32>
    %6 = vector.shape_cast %5 : vector<128xf32> to vector<1x128xf32>
    %7 = arith.mulf %2, %2 : vector<256x128xf32>
    %cst_6 = arith.constant dense<0.000000e+00> : vector<128xf32>
    %8 = vector.multi_reduction <add>, %7, %cst_6 [0] : vector<256x128xf32> to vector<128xf32>
    %9 = vector.shape_cast %8 : vector<128xf32> to vector<1x128xf32>
    %10 = tpu.concatenate %6, %9 in 1 : vector<1x128xf32>, vector<1x128xf32> -> vector<1x256xf32>
    %c0_7 = arith.constant 0 : index
    %c0_8 = arith.constant 0 : index
    %11 = vector.load %arg4[%c0_7, %c0_8] : memref<1x256xf32, #tpu.memory_space<vmem>>, vector<1x256xf32>
    tpu.vector_store %arg4[%c0_7, %c0_8], %10 {strides = array<i32>} : memref<1x256xf32, #tpu.memory_space<vmem>>, vector<1x256xf32>,
    return
  }
  func.func @transform_0(%arg0: i32) -> (i32, i32) {
    %c0_i32 = arith.constant 0 : i32
    %c0_i32_0 = arith.constant 0 : i32
    return %arg0, %c0_i32 : i32, i32
  }
  func.func @transform_1(%arg0: i32) -> (i32, i32) {
    %c0_i32 = arith.constant 0 : i32
    %c0_i32_0 = arith.constant 0 : i32
    %c0_i32_1 = arith.constant 0 : i32
    return %c0_i32, %c0_i32_0 : i32, i32
  }
  func.func @transform_2(%arg0: i32) -> (i32, i32) {
    %c0_i32 = arith.constant 0 : i32
    %c0_i32_0 = arith.constant 0 : i32
    return %arg0, %c0_i32 : i32, i32
  }
  func.func @transform_3(%arg0: i32) -> (i32, i32) {
    %c0_i32 = arith.constant 0 : i32
    %c0_i32_0 = arith.constant 0 : i32
    return %arg0, %c0_i32 : i32, i32
  }
}

</mosaic_0001>

<bundles_post_ra>
// kernel: tpu_custom_call.1
= control target key start
LH: loop header
LB: loop body
LE: loop exit
PB: predicated region body
PF: predicated region fallthrough
CT: control target
= control target key end

     0   :  { %9 = vsyncpa [#allocation3], 0  ;;  %vm136_vm0 = vcmask 130048   ;;  %s1186_s0 = inlined_call_operand.vmem [shape: bf16[256,16], index: 0, kind: input, shape index: {}]   ;;  %s1187_s1 = inlined_call_operand.vmem [shape: bf16[16,128], index: 1, kind: input, shape index: {}]   ;;  %s1188_s2 = inlined_call_operand.hbm [shape: bf16[256,128], index: 2, kind: output, shape index: {0}]   ;;  %s1189_s3 = inlined_call_operand.hbm [shape: f32[1,256], index: 3, kind: output, shape index: {1}]  }
   0x1   :  { %v915_v0 = vld [vmem:[%s1187_s1] sm:$0xff]   ;;  %v917_v2 = vld [vmem:[%s1186_s0 + $0x8] sm:$0xff]   ;;  %v918_v3 = vld [vmem:[%s1186_s0 + $0x10] sm:$0xff]  }
   0x2   :  { %v916_v1 = vld [vmem:[%s1186_s0] sm:$0xff]   ;;  %874 = vmatprep.subr.bf16.mxu0 %v915_v0  ;;  %908 = vmatprep.subr.bf16.mxu1 %v915_v0  ;;  %v919_v4 = vld [vmem:[%s1186_s0 + $0x18] sm:$0xff]   ;;  %v925_v7 = vld [vmem:[%s1186_s0 + $0x48] sm:$0xff]  }
   0x3   :  { %875 = vmatpush3.bf16.msra.mxu0 %v915_v0  ;;  %876 = vmatprep.mubr.msk.bf16.mxu0 %vm136_vm0, %v916_v1  ;;  %v920_v5 = vld [vmem:[%s1186_s0 + $0x20] sm:$0xff]   ;;  %v926_v8 = vld [vmem:[%s1186_s0 + $0x50] sm:$0xff]   ;;  %v927_v9 = vld [vmem:[%s1186_s0 + $0x58] sm:$0xff]  }
   0x4   :  { %909 = vmatpush3.bf16.msra.mxu1 %v915_v0  ;;  %v924_v6 = vld [vmem:[%s1186_s0 + $0x40] sm:$0xff]  }
   0x5   :  { %892 = vmatprep.mubr.msk.bf16.mxu1 %vm136_vm0, %v924_v6  ;;  %v928_v10 = vld [vmem:[%s1186_s0 + $0x60] sm:$0xff]  }
   0x6   :  { %877 = vmatmul.mubr.msk.bf16.vlgmr.msra.gmra.mrb[0].mxu0 %vm136_vm0, %v917_v2 }
   0x7   :  { %880 = vmatprep.mubr.msk.bf16.mxu0 %vm136_vm0, %v918_v3  ;;  %893 = vmatmul.mubr.msk.bf16.vlgmr.msra.gmra.mrb[0].mxu1 %vm136_vm0, %v925_v7 }
   0x8   :  { %896 = vmatprep.mubr.msk.bf16.mxu1 %vm136_vm0, %v926_v8 }
   0xe   :  { %881 = vmatmul.mubr.msk.bf16.gmra.mrb[4].mxu0 %vm136_vm0, %v919_v4 }
   0xf   :  { %884 = vmatprep.mubr.msk.bf16.mxu0 %vm136_vm0, %v920_v5 }
  0x10   :  { %10 = vsyncpa [#allocation5], 0  ;;  %v921_v11 = vld [vmem:[%s1186_s0 + $0x28] sm:$0xff]   ;;  %v922_v12 = vld [vmem:[%s1186_s0 + $0x30] sm:$0xff]   ;;  %897 = vmatmul.mubr.msk.bf16.gmra.mrb[4].mxu1 %vm136_vm0, %v927_v9 }
  0x11   :  { %900 = vmatprep.mubr.msk.bf16.mxu1 %vm136_vm0, %v928_v10  ;;  %v929_v13 = vld [vmem:[%s1186_s0 + $0x68] sm:$0xff]   ;;  %v930_v14 = vld [vmem:[%s1186_s0 + $0x70] sm:$0xff]   ;;  %v923_v15 = vld [vmem:[%s1186_s0 + $0x38] sm:$0xff]  }
  0x12   :  { %v931_v16 = vld [vmem:[%s1186_s0 + $0x78] sm:$0xff]   ;;  %s980_s0 = smov [#allocation2]  }
  0x13   :  { %s640_s18 = sshll.u32 %s980_s0, 4  ;;  %s641_s18 = int_to_ptr.vmem [resolvable:$true] %s640_s18 }
  0x14   :  { %s932_s19 = scalar_lea.vmem %s641_s18, 2048  ;;  %p937_p1 = scmp.lt.s32.totalorder %s641_s18, %s641_s18 }
  0x15   :  { %p933_p0 = scmp.ne.s32.totalorder %s641_s18, %s932_s19  ;;  %p938_p2 = scmp.lt.s32.totalorder %s932_s19, %s932_s19 }
  0x16   :  { %885 = vmatmul.mubr.msk.bf16.gmra.mrb[8].mxu0 %vm136_vm0, %v921_v11 }
  0x17   :  { %888 = vmatprep.mubr.msk.bf16.mxu0 %vm136_vm0, %v922_v12  ;;  %p939_p3 = por %p938_p2, %p937_p1 }
  0x18   :  { %901 = vmatmul.mubr.msk.bf16.gmra.mrb[8].mxu1 %vm136_vm0, %v929_v13 }
  0x19   :  { %904 = vmatprep.mubr.msk.bf16.mxu1 %vm136_vm0, %v930_v14  ;;  %p940_p4 = pnand %p939_p3, %p933_p0 }
  0x1e   :  { %889 = vmatmul.mubr.msk.bf16.gmra.mrb[12].mxu0 %vm136_vm0, %v923_v15 }
  0x20   :  { %905 = vmatmul.mubr.msk.bf16.gmra.mrb[12].mxu1 %vm136_vm0, %v931_v16 }
  0xd9   :  { %v878_v17 = vpop.f32.mrb[0].mxu0 }
  0xda   :  { %v219_v18 = vpop.f32.mrb[1].mxu0  ;;  %v545_v26 = vmul.f32 %v878_v17, %v878_v17  ;;  %v1072_v29 = vpop.f32.mrb[0].mxu1 }
  0xdb   :  { %v879_v19 = vpop.f32.mrb[2].mxu0  ;;  %v543_v22 = vmul.f32 %v219_v18, %v219_v18  ;;  %v1074_v30 = vpop.f32.mrb[1].mxu1 }
  0xdc   :  { %v770_v20 = vpack.c.bf16 %v879_v19, %v878_v17  ;;  %v222_v21 = vpop.f32.mrb[3].mxu0  ;;  %v546_v31 = vmul.f32 %v879_v19, %v879_v19  ;;  %v1076_v35 = vpop.f32.mrb[2].mxu1 }
  0xdd   :  { %v765_v23 = vpack.c.bf16 %v222_v21, %v219_v18  ;;  %v506_v24 = vadd.f32 %v222_v21, %v219_v18  ;;  %v544_v25 = vmul.f32 %v222_v21, %v222_v21  ;;  %v810_v37 = vpack.c.bf16 %v1076_v35, %v1072_v29  ;;  %v1080_v38 = vpop.f32.mrb[3].mxu1 }
  0xde   :  { %842 = vst [vmem:[#allocation2 + $0x8] sm:$0xff] %v770_v20   ;;  %v805_v43 = vpack.c.bf16 %v1080_v38, %v1074_v30 }
  0xdf   :  { %766 = vst [vmem:[#allocation2] sm:$0xff] %v765_v23   ;;  %v507_v27 = vadd.f32 %v878_v17, %v506_v24  ;;  %v575_v28 = vadd.f32 %v544_v25, %v543_v22  ;;  %850 = vst [vmem:[#allocation2 + $0x48] sm:$0xff] %v810_v37  }
  0xe0   :  { %849 = vst [vmem:[#allocation2 + $0x40] sm:$0xff] %v805_v43  }
  0xe1   :  { %v576_v32 = vadd.f32 %v575_v28, %v545_v26  ;;  %v882_v33 = vpop.f32.mrb[4].mxu0  ;;  %v508_v34 = vadd.f32 %v879_v19, %v507_v27 }
  0xe2   :  { %v235_v36 = vpop.f32.mrb[5].mxu0  ;;  %v549_v50 = vmul.f32 %v882_v33, %v882_v33 }
  0xe3   :  { %v509_v39 = vadd.f32 %v508_v34, %v235_v36  ;;  %v547_v40 = vmul.f32 %v235_v36, %v235_v36  ;;  %v577_v41 = vadd.f32 %v576_v32, %v546_v31  ;;  %v883_v42 = vpop.f32.mrb[6].mxu0  ;;  %v1084_v53 = vpop.f32.mrb[4].mxu1 }
  0xe4   :  { %v780_v44 = vpack.c.bf16 %v883_v42, %v882_v33  ;;  %v238_v45 = vpop.f32.mrb[7].mxu0  ;;  %v1086_v54 = vpop.f32.mrb[5].mxu1  ;;  %v550_v55 = vmul.f32 %v883_v42, %v883_v42 }
  0xe5   :  { %v578_v46 = vadd.f32 %v577_v41, %v547_v40  ;;  %v775_v47 = vpack.c.bf16 %v238_v45, %v235_v36  ;;  %v510_v48 = vadd.f32 %v509_v39, %v238_v45  ;;  %v548_v49 = vmul.f32 %v238_v45, %v238_v45  ;;  %v1088_v59 = vpop.f32.mrb[6].mxu1 }
  0xe6   :  { %844 = vst [vmem:[#allocation2 + $0x18] sm:$0xff] %v780_v44   ;;  %v820_v61 = vpack.c.bf16 %v1088_v59, %v1084_v53  ;;  %v1092_v62 = vpop.f32.mrb[7].mxu1 }
  0xe7   :  { %843 = vst [vmem:[#allocation2 + $0x10] sm:$0xff] %v775_v47   ;;  %v511_v51 = vadd.f32 %v882_v33, %v510_v48  ;;  %v579_v52 = vadd.f32 %v578_v46, %v548_v49  ;;  %v815_v3 = vpack.c.bf16 %v1092_v62, %v1086_v54  ;;  %v559_v46 = vmul.f32 %v1074_v30, %v1074_v30 }
  0xe8   :  { %852 = vst [vmem:[#allocation2 + $0x58] sm:$0xff] %v820_v61  }
  0xe9   :  { %v580_v56 = vadd.f32 %v579_v52, %v549_v50  ;;  %v886_v57 = vpop.f32.mrb[8].mxu0  ;;  %v512_v58 = vadd.f32 %v883_v42, %v511_v51  ;;  %851 = vst [vmem:[#allocation2 + $0x50] sm:$0xff] %v815_v3  }
  0xea   :  { %v251_v60 = vpop.f32.mrb[9].mxu0  ;;  %v553_v10 = vmul.f32 %v886_v57, %v886_v57 }
  0xeb   :  { %v513_v63 = vadd.f32 %v512_v58, %v251_v60  ;;  %v551_v0 = vmul.f32 %v251_v60, %v251_v60  ;;  %v581_v1 = vadd.f32 %v580_v56, %v550_v55  ;;  %v887_v2 = vpop.f32.mrb[10].mxu0  ;;  %v1096_v13 = vpop.f32.mrb[8].mxu1 }
  0xec   :  { %v790_v4 = vpack.c.bf16 %v887_v2, %v886_v57  ;;  %v254_v5 = vpop.f32.mrb[11].mxu0  ;;  %v1098_v14 = vpop.f32.mrb[9].mxu1  ;;  %v554_v15 = vmul.f32 %v887_v2, %v887_v2 }
  0xed   :  { %v582_v6 = vadd.f32 %v581_v1, %v551_v0  ;;  %v785_v7 = vpack.c.bf16 %v254_v5, %v251_v60  ;;  %v514_v8 = vadd.f32 %v513_v63, %v254_v5  ;;  %v552_v9 = vmul.f32 %v254_v5, %v254_v5  ;;  %v1100_v19 = vpop.f32.mrb[10].mxu1 }
  0xee   :  { %846 = vst [vmem:[#allocation2 + $0x28] sm:$0xff] %v790_v4   ;;  %v830_v21 = vpack.c.bf16 %v1100_v19, %v1096_v13  ;;  %v1104_v22 = vpop.f32.mrb[11].mxu1 }
  0xef   :  { %845 = vst [vmem:[#allocation2 + $0x20] sm:$0xff] %v785_v7   ;;  %v515_v11 = vadd.f32 %v886_v57, %v514_v8  ;;  %v583_v12 = vadd.f32 %v582_v6, %v552_v9  ;;  %v825_v27 = vpack.c.bf16 %v1104_v22, %v1098_v14  ;;  %v560_v57 = vmul.f32 %v1080_v38, %v1080_v38 }
  0xf0   :  { %854 = vst [vmem:[#allocation2 + $0x68] sm:$0xff] %v830_v21  }
  0xf1   :  { %v584_v16 = vadd.f32 %v583_v12, %v553_v10  ;;  %v890_v17 = vpop.f32.mrb[12].mxu0  ;;  %v516_v18 = vadd.f32 %v887_v2, %v515_v11  ;;  %853 = vst [vmem:[#allocation2 + $0x60] sm:$0xff] %v825_v27  }
  0xf2   :  { %v267_v20 = vpop.f32.mrb[13].mxu0  ;;  %v557_v37 = vmul.f32 %v890_v17, %v890_v17 }
  0xf3   :  { %v517_v23 = vadd.f32 %v516_v18, %v267_v20  ;;  %v555_v24 = vmul.f32 %v267_v20, %v267_v20  ;;  %v585_v25 = vadd.f32 %v584_v16, %v554_v15  ;;  %v891_v26 = vpop.f32.mrb[14].mxu0  ;;  %v1108_v41 = vpop.f32.mrb[12].mxu1 }
  0xf4   :  { %v800_v28 = vpack.c.bf16 %v891_v26, %v890_v17  ;;  %v270_v31 = vpop.f32.mrb[15].mxu0  ;;  %v1110_v42 = vpop.f32.mrb[13].mxu1  ;;  %v558_v43 = vmul.f32 %v891_v26, %v891_v26 }
  0xf5   :  { %v586_v32 = vadd.f32 %v585_v25, %v555_v24  ;;  %v795_v33 = vpack.c.bf16 %v270_v31, %v267_v20  ;;  %v518_v34 = vadd.f32 %v517_v23, %v270_v31  ;;  %v556_v36 = vmul.f32 %v270_v31, %v270_v31  ;;  %v1114_v47 = vpop.f32.mrb[14].mxu1 }
  0xf6   :  { %848 = vst [vmem:[#allocation2 + $0x38] sm:$0xff] %v800_v28   ;;  %v840_v48 = vpack.c.bf16 %v1114_v47, %v1108_v41  ;;  %v334_v49 = vpop.f32.mrb[15].mxu1 }
  0xf7   :  { %847 = vst [vmem:[#allocation2 + $0x30] sm:$0xff] %v795_v33   ;;  %v519_v39 = vadd.f32 %v890_v17, %v518_v34  ;;  %v587_v40 = vadd.f32 %v586_v32, %v556_v36  ;;  %v835_v52 = vpack.c.bf16 %v334_v49, %v1110_v42 }
  0xf8   :  { %856 = vst [vmem:[#allocation2 + $0x78] sm:$0xff] %v840_v48  }
  0xf9   :  { %v588_v44 = vadd.f32 %v587_v40, %v557_v37  ;;  %v520_v45 = vadd.f32 %v891_v26, %v519_v39  ;;  %855 = vst [vmem:[#allocation2 + $0x70] sm:$0xff] %v835_v52  }
  0xfb   :  { %v521_v50 = vadd.f32 %v520_v45, %v1074_v30  ;;  %v589_v51 = vadd.f32 %v588_v44, %v558_v43 }
  0xfd   :  { %v590_v55 = vadd.f32 %v589_v51, %v559_v46  ;;  %v522_v56 = vadd.f32 %v521_v50, %v1080_v38 }
  0xfe   :  { %943 = shalt.err (!%p940_p4)
}
  0xff   :  { %s944_s21 = scalar_lea.hbm %s1188_s2, 2048 }
 0x100   :  { %p945_p5 = scmp.ne.s32.totalorder %s1188_s2, %s944_s21  ;;  %p948_p6 = scmp.lt.u32.totalorder %s944_s21, %s1188_s2 }
 0x102   :  { %p950_p7 = pnand %p948_p6, %p945_p5 }
 0x104   :  { %953 = shalt.err (!%p950_p7)
}
 0x105   :  { %s981_s26 = smov 64   ;;  %s982_s27 = smov 4   ;;  %v561_v30 = vmul.f32 %v1072_v29, %v1072_v29  ;;  %v523_v38 = vadd.f32 %v1072_v29, %v522_v56  ;;  %v591_v58 = vadd.f32 %v590_v55, %v560_v57  ;;  %v562_v60 = vmul.f32 %v1076_v35, %v1076_v35 }
 0x106   :  { %646 = dma.vmem_to_hbm [thread:$0]  %s641_s18, 2048, %s1188_s2, [#allocation3], %s981_s26, %s981_s26, %s982_s27   ;;  %v563_v0 = vmul.f32 %v1086_v54, %v1086_v54  ;;  %v564_v5 = vmul.f32 %v1092_v62, %v1092_v62  ;;  %v565_v29 = vmul.f32 %v1084_v53, %v1084_v53  ;;  %v568_v15 = vmul.f32 %v1104_v22, %v1104_v22 }
 0x107   :  { %v592_v61 = vadd.f32 %v591_v58, %v561_v30  ;;  %v524_v63 = vadd.f32 %v1076_v35, %v523_v38  ;;  %v566_v35 = vmul.f32 %v1088_v59, %v1088_v59  ;;  %v572_v25 = vmul.f32 %v334_v49, %v334_v49  ;;  %s984_s2 = smov [#allocation4]  }
 0x108   :  { %v573_v26 = vmul.f32 %v1108_v41, %v1108_v41  ;;  %v574_v28 = vmul.f32 %v1114_v47, %v1114_v47  ;;  %v983_v40 = vmov 1966171168   ;;  %v618_v43 = vlaneseq  ;;  %s653_s30 = sshll.u32 %s984_s2, 4  ;;  %s654_s30 = int_to_ptr.vmem [resolvable:$true] %s653_s30 }
 0x109   :  { %v525_v1 = vadd.f32 %v524_v63, %v1086_v54  ;;  %v593_v2 = vadd.f32 %v592_v61, %v562_v60  ;;  %v567_v54 = vmul.f32 %v1098_v14, %v1098_v14  ;;  %s954_s4 = scalar_lea.vmem %s654_s30, 32  ;;  %p959_p9 = scmp.lt.s32.totalorder %s654_s30, %s654_s30 }
 0x10a   :  { %vm632_vm1 = vcmp.lt.s32.totalorder %v618_v43, 256  ;;  %p955_p8 = scmp.ne.s32.totalorder %s654_s30, %s954_s4  ;;  %p960_p10 = scmp.lt.s32.totalorder %s954_s4, %s954_s4 }
 0x10b   :  { %v594_v3 = vadd.f32 %v593_v2, %v563_v0  ;;  %v526_v4 = vadd.f32 %v525_v1, %v1092_v62 }
 0x10c   :  { %p961_p11 = por %p960_p10, %p959_p9 }
 0x10d   :  { %v527_v6 = vadd.f32 %v1084_v53, %v526_v4  ;;  %v595_v7 = vadd.f32 %v594_v3, %v564_v5  ;;  %v569_v53 = vmul.f32 %v1096_v13, %v1096_v13 }
 0x10e   :  { %p962_p12 = pnand %p961_p11, %p955_p8 }
 0x10f   :  { %v596_v8 = vadd.f32 %v595_v7, %v565_v29  ;;  %v528_v9 = vadd.f32 %v1088_v59, %v527_v6  ;;  %v570_v59 = vmul.f32 %v1100_v19, %v1100_v19 }
 0x111   :  { %v529_v10 = vadd.f32 %v528_v9, %v1098_v14  ;;  %v597_v11 = vadd.f32 %v596_v8, %v566_v35  ;;  %v571_v14 = vmul.f32 %v1110_v42, %v1110_v42 }
 0x113   :  { %v598_v12 = vadd.f32 %v597_v11, %v567_v54  ;;  %v530_v62 = vadd.f32 %v529_v10, %v1104_v22 }
 0x115   :  { %v531_v16 = vadd.f32 %v1096_v13, %v530_v62  ;;  %v599_v17 = vadd.f32 %v598_v12, %v568_v15 }
 0x117   :  { %v600_v18 = vadd.f32 %v599_v17, %v569_v53  ;;  %v532_v20 = vadd.f32 %v1100_v19, %v531_v16 }
 0x119   :  { %v533_v21 = vadd.f32 %v532_v20, %v1110_v42  ;;  %v601_v23 = vadd.f32 %v600_v18, %v570_v59  ;;  %v616_v42 = vunpack.c.l.s4 %v983_v40 }
 0x11b   :  { %v602_v24 = vadd.f32 %v601_v23, %v571_v14  ;;  %v534_v22 = vadd.f32 %v533_v21, %v334_v49  ;;  %v617_v48 = vunpack.c.0.s8 %v616_v42  ;;  %v619_v49 = vshrl.u32 %v618_v43, 7 }
 0x11d   :  { %v535_v13 = vadd.f32 %v1108_v41, %v534_v22  ;;  %v603_v27 = vadd.f32 %v602_v24, %v572_v25 }
 0x11f   :  { %v536_v19 = vadd.f32 %v1114_v47, %v535_v13  ;;  %v604_v31 = vadd.f32 %v603_v27, %v573_v26  ;;  %v620_v47 = vsub.s32 %v617_v48, %v619_v49 }
 0x121   :  { %v537_v32 = vrot.slane %v536_v19, 4  ;;  %v605_v33 = vadd.f32 %v604_v31, %v574_v28 }
 0x123   :  { %v538_v34 = vadd.f32 %v537_v32, %v536_v19  ;;  %v606_v36 = vrot.slane %v605_v33, 4 }
 0x125   :  { %v539_v37 = vrot.slane %v538_v34, 2  ;;  %v607_v39 = vadd.f32 %v606_v36, %v605_v33 }
 0x127   :  { %v540_v44 = vadd.f32 %v539_v37, %v538_v34  ;;  %v608_v45 = vrot.slane %v607_v39, 2 }
 0x129   :  { %v541_v46 = vrot.slane %v540_v44, 1  ;;  %v609_v41 = vadd.f32 %v608_v45, %v607_v39 }
 0x12b   :  { %v610_v50 = vrot.slane %v609_v41, 1  ;;  %v542_v51 = vadd.f32 %v541_v46, %v540_v44 }
 0x12d   :  { %v611_v52 = vadd.f32 %v610_v50, %v609_v41 }
 0x12f   :  { %v614_v55 = vcombine.low %v542_v51, %v611_v52 }
 0x131   :  { %v621_v56 = vrot.slane %v614_v55, %v620_v47 }
 0x133   :  { %v628_v57 = vrot.slane %v621_v56, %v620_v47 }
 0x135   :  { %634 = vst.msk [vmem:[#allocation4] sm:$0x3] %vm632_vm1, %v628_v57 }
 0x136   :  { %965 = shalt.err (!%p962_p12)
}
 0x137   :  { %s966_s7 = scalar_lea.hbm %s1189_s3, 32 }
 0x138   :  { %p967_p13 = scmp.ne.s32.totalorder %s1189_s3, %s966_s7  ;;  %p970_p0 = scmp.lt.u32.totalorder %s966_s7, %s1189_s3 }
 0x13a   :  { %p972_p1 = pnand %p970_p0, %p967_p13 }
 0x13c   :  { %975 = shalt.err (!%p972_p1)
}
 0x13d   :  { %656 = dma.vmem_to_hbm [thread:$0]  %s654_s30, 32, %s1189_s3, [#allocation5]  }
 0x13e   :  { %976 = dma.done.wait [#allocation3], 2048  }
 0x13f   :  { %977 = vsyncadd [#allocation3], 4294965248 }
 0x140   :  { %978 = dma.done.wait [#allocation5], 32  }
 0x141   :  { %979 = vsyncadd [#allocation5], 4294967264 }
 0x142   :  { %663 = vsyncpa [#allocation3], 1 }
 0x143   :  { %664 = vsyncpa [#allocation5], 1 }

</bundles_post_ra>
